<compile_context>
chip_gen: v7x
topology: tpu7x:2x2x1
jax: 0.10.0
libtpu: 0.0.40
codegen_flags: <defaults>
</compile_context>

<pallas_src>
import functools
import math

import jax
import jax.numpy as jnp
from jax.experimental import pallas as pl
from jax.experimental.pallas import tpu as pltpu

# log(1e-45) evaluated in float64 (PyTorch/CPU does not flush the subnormal
# 1e-45, so masked positions get z + log(1e-45) ~= z - 103.6156).
_LOG_MASK_EPS = float(math.log(1e-45))


def _gumbel_softmax_kernel(logits_ref, mask_ref, gumbel_ref, out_ref,
                           *, inv_temperature, hard):
    # Load in native dtype, compute in f32.
    logits = logits_ref[...].astype(jnp.float32)
    g = gumbel_ref[...].astype(jnp.float32)
    z = (logits + g) * inv_temperature

    # Binary {0,1} mask (as in the original usage): masked lanes get
    # z + log(1e-45); unmasked lanes get z + log(1 + 1e-45) == z.
    # VPU select instead of a per-element log on the EUP.
    z = jnp.where(mask_ref[...] != 0, z, z + _LOG_MASK_EPS)

    # Numerically stable log_softmax over the last (lane) axis.
    m = jnp.max(z, axis=-1, keepdims=True)
    shifted = z - m
    lse = jnp.log(jnp.sum(jnp.exp(shifted), axis=-1, keepdims=True))
    y_soft = shifted - lse

    if hard:
        # One-hot of argmax(y_soft) == argmax(z); reuse the row max m instead of
        # a second cross-lane argmax reduction.  Ties are measure-zero with
        # continuous gumbel noise (exact ties would set multiple lanes).
        # TODO(synk): straight-through gradient (y_hard - y_soft.detach() + y_soft)
        # is not implemented; forward value only (no custom_vjp).
        out_ref[...] = (z == m).astype(out_ref.dtype)
    else:
        out_ref[...] = y_soft.astype(out_ref.dtype)


def gumbel_softmax(logits, output_mask, gumbel, *, temperature=1.0,
                   hard=False, tile_rows=1024,
                   vmem_budget_bytes=8 * 1024 * 1024):
    """logits: (..., V) any float dtype; output_mask: (..., V) binary (any dtype,
    int8/bool preferred); gumbel: (V,). Returns logits.dtype array, same shape."""
    orig_shape = logits.shape
    V = int(orig_shape[-1])
    rows = 1
    for d in orig_shape[:-1]:
        rows *= int(d)

    out_dtype = logits.dtype
    logits2d = logits.reshape(rows, V)          # native dtype, no extra HBM pass
    mask2d = output_mask.reshape(rows, V)       # native dtype (int8/bool ok)
    gumbel2d = gumbel.reshape(1, V)

    # --- adaptive tile sizing ---------------------------------------------
    # Streamed bytes per row (in + mask + out), double-buffered by the pipeline.
    bytes_per_row = V * (logits2d.dtype.itemsize
                         + mask2d.dtype.itemsize
                         + jnp.dtype(out_dtype).itemsize)
    max_rows_vmem = max(8, (vmem_budget_bytes // (2 * max(bytes_per_row, 1))) // 8 * 8)
    rows_padded8 = ((rows + 7) // 8) * 8
    tile_rows = int(min(tile_rows, max_rows_vmem, rows_padded8))
    tile_rows = max(8, (tile_rows // 8) * 8)
    # TODO(synk): for vocab-scale V (>~8K) split V over a second 'arbitrary' grid
    # axis with an online max/logsumexp accumulator instead of shrinking tile_rows.

    grid = (pl.cdiv(rows, tile_rows),)

    kernel = functools.partial(
        _gumbel_softmax_kernel,
        inv_temperature=float(1.0 / temperature),
        hard=bool(hard),
    )

    out2d = pl.pallas_call(
        kernel,
        out_shape=jax.ShapeDtypeStruct((rows, V), out_dtype),
        grid_spec=pltpu.PrefetchScalarGridSpec(
            num_scalar_prefetch=0,
            grid=grid,
            in_specs=[
                pl.BlockSpec((tile_rows, V), lambda i: (i, 0)),  # logits
                pl.BlockSpec((tile_rows, V), lambda i: (i, 0)),  # output_mask
                pl.BlockSpec((1, V), lambda i: (0, 0)),          # gumbel (broadcast)
            ],
            out_specs=pl.BlockSpec((tile_rows, V), lambda i: (i, 0)),
        ),
        compiler_params=pltpu.CompilerParams(
            dimension_semantics=("parallel",)),   # shards rows across TCs on v7x
    )(logits2d, mask2d, gumbel2d)

    return out2d.reshape(orig_shape)


def _reference(logits, output_mask, gumbel, temperature=1.0):
    # Matches the PyTorch CPU forward for a binary mask (CPU does not flush the
    # 1e-45 subnormal, so masked lanes get + log(1e-45)).
    z = (logits.astype(jnp.float32) + gumbel.astype(jnp.float32)) / temperature
    z = jnp.where(output_mask != 0, z, z + _LOG_MASK_EPS)
    return jax.nn.log_softmax(z, axis=-1)


if __name__ == "__main__":
    key = jax.random.PRNGKey(0)
    k_logits, k_mask, k_gumbel = jax.random.split(key, 3)

    B, T, V = 2, 8, 128
    temperature = 1.0

    logits = jax.random.normal(k_logits, (B, T, V), dtype=jnp.float32)

    # Binary output mask as int8 (4x fewer streamed bytes than f32); guarantee
    # at least one valid position per row.
    mask = jax.random.bernoulli(k_mask, p=0.7, shape=(B, T, V)).astype(jnp.int8)
    mask = mask.at[:, :, 0].set(1)

    # Gumbel noise sampled over the LAST dim only (matches torch.rand(logits.size()[-1]))
    U = jax.random.uniform(k_gumbel, (V,), dtype=jnp.float32)
    gumbel = -jnp.log(-jnp.log(U + 1e-20) + 1e-20)

    # soft (default) path
    out = gumbel_softmax(logits, mask, gumbel, temperature=temperature, hard=False)
    out = jax.block_until_ready(out)

    ref = _reference(logits, mask, gumbel, temperature)
    assert out.shape == logits.shape
    assert jnp.isfinite(out).all(), "non-finite values in soft output"
    assert jnp.allclose(out, ref, atol=1e-4, rtol=1e-4), "mismatch vs reference"

    # hard path (forward one-hot)
    out_hard = gumbel_softmax(logits, mask, gumbel, temperature=temperature, hard=True)
    out_hard = jax.block_until_ready(out_hard)
    assert jnp.allclose(jnp.sum(out_hard, axis=-1), 1.0), "hard output rows not one-hot"
    assert jnp.array_equal(jnp.argmax(out_hard, axis=-1), jnp.argmax(ref, axis=-1)), \
        "hard one-hot index mismatch vs reference argmax"

    print("KERNEL_OK")
</pallas_src>

<mosaic_0001>
module attributes {stable_mosaic.version = 11 : i64} {
  func.func @_gumbel_softmax_kernel(%arg0: i32, %arg1: memref<16x128xf32, #tpu.memory_space<vmem>>, %arg2: memref<16x128xi8, #tpu.memory_space<vmem>>, %arg3: memref<1x128xf32, #tpu.memory_space<vmem>>, %arg4: memref<16x128xf32, #tpu.memory_space<vmem>>) attributes {dimension_semantics = [#tpu.dimension_semantics<parallel>], iteration_bounds = array<i64: 1>, scalar_prefetch = 0 : i64, scratch_operands = 0 : i64, tpu.core_type = #tpu.core_type<tc>, window_params = [{transform_indices = @transform_0, window_bounds = array<i64: 16, 128>}, {transform_indices = @transform_1, window_bounds = array<i64: 16, 128>}, {pipeline_mode = #tpu.pipeline_mode<synchronous>, transform_indices = @transform_2, window_bounds = array<i64: 1, 128>}, {transform_indices = @transform_3, window_bounds = array<i64: 16, 128>}]} {
    %c0 = arith.constant 0 : index
    %c0_0 = arith.constant 0 : index
    %0 = vector.load %arg1[%c0, %c0_0] : memref<16x128xf32, #tpu.memory_space<vmem>>, vector<16x128xf32>
    %c0_1 = arith.constant 0 : index
    %c0_2 = arith.constant 0 : index
    %1 = vector.load %arg3[%c0_1, %c0_2] : memref<1x128xf32, #tpu.memory_space<vmem>>, vector<1x128xf32>
    %2 = vector.broadcast %1 : vector<1x128xf32> to vector<16x128xf32>
    %3 = arith.addf %0, %2 : vector<16x128xf32>
    %cst = arith.constant 1.000000e+00 : f32
    %4 = vector.broadcast %cst : f32 to vector<16x128xf32>
    %5 = arith.mulf %3, %4 : vector<16x128xf32>
    %c0_3 = arith.constant 0 : index
    %c0_4 = arith.constant 0 : index
    %6 = vector.load %arg2[%c0_3, %c0_4] : memref<16x128xi8, #tpu.memory_space<vmem>>, vector<16x128xi8>
    %c0_i8 = arith.constant 0 : i8
    %7 = vector.broadcast %c0_i8 : i8 to vector<16x128xi8>
    %8 = arith.cmpi ne, %6, %7 : vector<16x128xi8>
    %cst_5 = arith.constant -103.616325 : f32
    %9 = vector.broadcast %cst_5 : f32 to vector<16x128xf32>
    %10 = arith.addf %5, %9 : vector<16x128xf32>
    %11 = arith.select %8, %5, %10 : vector<16x128xi1>, vector<16x128xf32>
    %cst_6 = arith.constant dense<0xFF800000> : vector<16xf32>
    %12 = vector.multi_reduction <maximumf>, %11, %cst_6 [1] : vector<16x128xf32> to vector<16xf32>
    %13 = vector.shape_cast %12 : vector<16xf32> to vector<16x1xf32>
    %14 = vector.broadcast %13 : vector<16x1xf32> to vector<16x128xf32>
    %15 = arith.subf %11, %14 : vector<16x128xf32>
    %16 = math.exp %15 : vector<16x128xf32>
    %cst_7 = arith.constant dense<0.000000e+00> : vector<16xf32>
    %17 = vector.multi_reduction <add>, %16, %cst_7 [1] : vector<16x128xf32> to vector<16xf32>
    %18 = vector.shape_cast %17 : vector<16xf32> to vector<16x1xf32>
    %19 = math.log %18 : vector<16x1xf32>
    %20 = vector.broadcast %19 : vector<16x1xf32> to vector<16x128xf32>
    %21 = arith.subf %15, %20 : vector<16x128xf32>
    %c0_8 = arith.constant 0 : index
    %c0_9 = arith.constant 0 : index
    %22 = vector.load %arg4[%c0_8, %c0_9] : memref<16x128xf32, #tpu.memory_space<vmem>>, vector<16x128xf32>
    tpu.vector_store %arg4[%c0_8, %c0_9], %21 {strides = array<i32>} : memref<16x128xf32, #tpu.memory_space<vmem>>, vector<16x128xf32>,
    return
  }
  func.func @transform_0(%arg0: i32) -> (i32, i32) {
    %c0_i32 = arith.constant 0 : i32
    %c0_i32_0 = arith.constant 0 : i32
    return %arg0, %c0_i32 : i32, i32
  }
  func.func @transform_1(%arg0: i32) -> (i32, i32) {
    %c0_i32 = arith.constant 0 : i32
    %c0_i32_0 = arith.constant 0 : i32
    return %arg0, %c0_i32 : i32, i32
  }
  func.func @transform_2(%arg0: i32) -> (i32, i32) {
    %c0_i32 = arith.constant 0 : i32
    %c0_i32_0 = arith.constant 0 : i32
    %c0_i32_1 = arith.constant 0 : i32
    return %c0_i32, %c0_i32_0 : i32, i32
  }
  func.func @transform_3(%arg0: i32) -> (i32, i32) {
    %c0_i32 = arith.constant 0 : i32
    %c0_i32_0 = arith.constant 0 : i32
    return %arg0, %c0_i32 : i32, i32
  }
}

</mosaic_0001>

<bundles_post_ra>
// kernel: tpu_custom_call.1
= control target key start
LH: loop header
LB: loop body
LE: loop exit
PB: predicated region body
PF: predicated region fallthrough
CT: control target
= control target key end

     0   :  { %8 = vsyncpa [#allocation3], 0  ;;  %s272_s0 = inlined_call_operand.hbm [shape: f32[16,128], index: 0, kind: input, shape index: {}]   ;;  %s273_s1 = inlined_call_operand.hbm [shape: s8[16,128], index: 1, kind: input, shape index: {}]   ;;  %s274_s2 = inlined_call_operand.vmem [shape: f32[1,128], index: 2, kind: input, shape index: {}]   ;;  %s275_s3 = inlined_call_operand.hbm [shape: f32[16,128], index: 3, kind: output, shape index: {}]  }
   0x1   :  { %9 = vsyncpa [#allocation6], 0 }
   0x2   :  { %10 = vsyncpa [#allocation4], 0  ;;  %s199_s12 = smov [#allocation2]   ;;  %s127_s16 = scalar_lea.hbm %s272_s0, 256 }
   0x3   :  { %s16_s13 = sshll.u32 %s199_s12, 4  ;;  %p128_p0 = scmp.ne.s32.totalorder %s272_s0, %s127_s16  ;;  %s17_s13 = int_to_ptr.vmem [resolvable:$true] %s16_s13 }
   0x4   :  { %p131_p1 = scmp.lt.u32.totalorder %s127_s16, %s272_s0 }
   0x6   :  { %p133_p2 = pnand %p131_p1, %p128_p0 }
   0x8   :  { %136 = shalt.err (!%p133_p2)
}
   0x9   :  { %s137_s21 = scalar_lea.vmem %s17_s13, 256  ;;  %p142_p4 = scmp.lt.s32.totalorder %s17_s13, %s17_s13 }
   0xa   :  { %p138_p3 = scmp.ne.s32.totalorder %s17_s13, %s137_s21  ;;  %p143_p5 = scmp.lt.s32.totalorder %s137_s21, %s137_s21 }
   0xc   :  { %p144_p6 = por %p143_p5, %p142_p4 }
   0xe   :  { %p145_p7 = pnand %p144_p6, %p138_p3 }
  0x10   :  { %148 = shalt.err (!%p145_p7)
}
  0x11   :  { %s200_s22 = smov 128   ;;  %s201_s23 = smov 8  }
  0x12   :  { %22 = dma.hbm_to_vmem [thread:$0]  %s272_s0, 256, %s17_s13, [#allocation3], %s200_s22, %s200_s22, %s201_s23  }
  0x13   :  { %s202_s26 = smov [#allocation5]   ;;  %s149_s30 = scalar_lea.hbm %s273_s1, 64 }
  0x14   :  { %s28_s27 = sshll.u32 %s202_s26, 4  ;;  %p150_p8 = scmp.ne.s32.totalorder %s273_s1, %s149_s30  ;;  %s29_s27 = int_to_ptr.vmem [resolvable:$true] %s28_s27 }
  0x15   :  { %p153_p9 = scmp.lt.u32.totalorder %s149_s30, %s273_s1 }
  0x17   :  { %p155_p10 = pnand %p153_p9, %p150_p8 }
  0x19   :  { %158 = shalt.err (!%p155_p10)
}
  0x1a   :  { %s159_s8 = scalar_lea.vmem %s29_s27, 64  ;;  %p164_p12 = scmp.lt.s32.totalorder %s29_s27, %s29_s27 }
  0x1b   :  { %p160_p11 = scmp.ne.s32.totalorder %s29_s27, %s159_s8  ;;  %p165_p13 = scmp.lt.s32.totalorder %s159_s8, %s159_s8 }
  0x1d   :  { %p166_p0 = por %p165_p13, %p164_p12 }
  0x1f   :  { %p167_p1 = pnand %p166_p0, %p160_p11 }
  0x21   :  { %170 = shalt.err (!%p167_p1)
}
  0x22   :  { %s203_s0 = smov 32   ;;  %s204_s9 = smov 2  }
  0x23   :  { %34 = dma.hbm_to_vmem [thread:$0]  %s273_s1, 64, %s29_s27, [#allocation6], %s203_s0, %s203_s0, %s204_s9  }
  0x24   :  { %193 = dma.done.wait [#allocation3], 256  }
  0x25   :  { %194 = vsyncadd [#allocation3], 4294967040 }
  0x26   :  { %195 = dma.done.wait [#allocation6], 64  }
  0x27   :  { %196 = vsyncadd [#allocation6], 4294967232  ;;  %v45_v0 = vld [vmem:[#allocation2] sm:$0xff]  ;;  %v56_v2 = vld [vmem:[#allocation5] sm:$0x3]  ;;  %v205_v6 = vmov 0  }
  0x28   :  { %v110_v1 = vld [vmem:[%s274_s2] ss:$0 sm:$0xff]  ;;  %vm58_vm0 = vnez %v56_v2  ;;  %v46_v4 = vld [vmem:[#allocation2 + $0x8] sm:$0xff]  ;;  %v57_v5 = vld [vmem:[#allocation5 + $0x2] sm:$0x3]  ;;  %s206_s1 = smov [#allocation7]  }
  0x29   :  { %v54_v3 = vadd.f32 %v110_v1, %v45_v0  ;;  %v62_v7 = vsel %vm58_vm0, 16843009, %v205_v6  ;;  %v55_v8 = vadd.f32 %v110_v1, %v46_v4  ;;  %vm59_vm1 = vnez %v57_v5  ;;  %s97_s2 = sshll.u32 %s206_s1, 4  ;;  %s98_s2 = int_to_ptr.vmem [resolvable:$true] %s97_s2 }
  0x2a   :  { %v64_v10 = vunpack.c.0.s8 %v62_v7  ;;  %v63_v11 = vsel %vm59_vm1, 16843009, %v205_v6  ;;  %s171_s14 = scalar_lea.vmem %s98_s2, 256  ;;  %p176_p3 = scmp.lt.s32.totalorder %s98_s2, %s98_s2 }
  0x2b   :  { %v60_v9 = vadd.f32 -103.616325, %v54_v3  ;;  %v61_v12 = vadd.f32 -103.616325, %v55_v8  ;;  %v65_v13 = vunpack.c.0.s8 %v63_v11  ;;  %p172_p2 = scmp.ne.s32.totalorder %s98_s2, %s171_s14  ;;  %p177_p4 = scmp.lt.s32.totalorder %s171_s14, %s171_s14 }
  0x2c   :  { %vm66_vm2 = vcmp.ne.s32.totalorder %v64_v10, 0 }
  0x2d   :  { %v68_v14 = vsel %vm66_vm2, %v54_v3, %v60_v9  ;;  %vm67_vm3 = vcmp.ne.s32.totalorder %v65_v13, 0  ;;  %p178_p5 = por %p177_p4, %p176_p3 }
  0x2e   :  { %70 = vmax.xlane.f32.xlu0 %v68_v14  ;;  %v69_v15 = vsel %vm67_vm3, %v55_v8, %v61_v12 }
  0x2f   :  { %p179_p6 = pnand %p178_p5, %p172_p2 }
  0x32   :  { %72 = vmax.xlane.f32.xlu0 %v69_v15 }
  0xbb   :  { %v71_v16 = vpop.xlane.xlu0 %70 }
  0xbc   :  { %v74_v17 = vsub.f32 %v68_v14, %v71_v16 }
  0xbe   :  { %v76_v18 = vmul.f32 1.442695, %v74_v17 }
  0xbf   :  { %v73_v19 = vpop.xlane.xlu0 %72 }
  0xc0   :  { %v75_v20 = vsub.f32 %v69_v15, %v73_v19  ;;  %119 = vpow2.f32 %v76_v18 }
  0xc2   :  { %v78_v21 = vmul.f32 1.442695, %v75_v20 }
  0xc4   :  { %121 = vpow2.f32 %v78_v21 }
  0xca   :  { %v120_v22 = vpop.eup %119 }
  0xcb   :  { %80 = vadd.xlane.f32.xlu1 %v120_v22 }
  0xce   :  { %v122_v23 = vpop.eup %121 }
  0xcf   :  { %82 = vadd.xlane.f32.xlu1 %v122_v23 }
 0x158   :  { %v81_v24 = vpop.xlane.xlu1 %80 }
 0x159   :  { %123 = vlog2.f32 %v81_v24 }
 0x15c   :  { %v83_v25 = vpop.xlane.xlu1 %82 }
 0x15d   :  { %125 = vlog2.f32 %v83_v25 }
 0x163   :  { %v124_v26 = vpop.eup %123 }
 0x164   :  { %v85_v27 = vmul.f32 0.6931472, %v124_v26 }
 0x166   :  { %v88_v28 = vsub.f32 %v74_v17, %v85_v27 }
 0x167   :  { %v126_v29 = vpop.eup %125 }
 0x168   :  { %90 = vst [vmem:[#allocation7] sm:$0xff] %v88_v28  ;;  %v87_v30 = vmul.f32 0.6931472, %v126_v29 }
 0x16a   :  { %v89_v31 = vsub.f32 %v75_v20, %v87_v30 }
 0x16c   :  { %91 = vst [vmem:[#allocation7 + $0x8] sm:$0xff] %v89_v31 }
 0x16d   :  { %182 = shalt.err (!%p179_p6)
}
 0x16e   :  { %s183_s17 = scalar_lea.hbm %s275_s3, 256 }
 0x16f   :  { %p184_p7 = scmp.ne.s32.totalorder %s275_s3, %s183_s17  ;;  %p187_p8 = scmp.lt.u32.totalorder %s183_s17, %s275_s3 }
 0x171   :  { %p189_p9 = pnand %p187_p8, %p184_p7 }
 0x173   :  { %192 = shalt.err (!%p189_p9)
}
 0x174   :  { %103 = dma.vmem_to_hbm [thread:$0]  %s98_s2, 256, %s275_s3, [#allocation4], %s200_s22, %s200_s22, %s201_s23  }
 0x175   :  { %197 = dma.done.wait [#allocation4], 256  }
 0x176   :  { %198 = vsyncadd [#allocation4], 4294967040 }
 0x177   :  { %107 = vsyncpa [#allocation3], 1 }
 0x178   :  { %108 = vsyncpa [#allocation6], 1 }
 0x179   :  { %109 = vsyncpa [#allocation4], 1 }

</bundles_post_ra>
